<compile_context>
chip_gen: v5e
topology: v5e:2x2
jax: 0.10.0
libtpu: 0.0.40
codegen_flags: <defaults>
</compile_context>

<pallas_src>
import jax
import jax.numpy as jnp
from jax.experimental import pallas as pl
from jax.experimental.pallas import tpu as pltpu

IMG_H, IMG_W = 32, 100
IN_CH = 1
FEAT = IN_CH * IMG_H * IMG_W   # 3200 = 25 * 128 (lane-dense)
T_DEC = 26                     # batch_max_length=25 -> target = labels_index[:, 1:]
NUM_CLASSES = 40               # logical charset size (chars + [PAD]/[SOS]/[EOS])
HIDDEN = 32                    # logical hidden size
H_PAD = 128                    # lane-padded hidden dim
C_PAD = 128                    # lane-padded class dim
PAD_IDX = 0                    # Converter.dict['[PAD]']
SOS_IDX = 1
EOS_IDX = 2


# -------------------- fused Pallas kernel --------------------

def _fused_ocr_loss_kernel(x_ref, we_ref, be_ref, pe_ref, wc_ref, bc_ref,
                           tgt_ref, o_ref):
    # x_ref:   (1, 1, FEAT)    f32   resized image (one sample), flattened lane-dense
    # we_ref:  (FEAT, H_PAD)   bf16  encoder weight (zero-padded cols >= HIDDEN)
    # be_ref:  (1, H_PAD)      f32
    # pe_ref:  (T_DEC, H_PAD)  f32   positional embedding
    # wc_ref:  (H_PAD, C_PAD)  bf16  classifier weight (zero-padded rows/cols)
    # bc_ref:  (1, C_PAD)      f32
    # tgt_ref: (1, T_DEC, 1)   int32 targets for this sample
    # o_ref:   (1, 1, 128)     f32   lane 0 = masked NLL sum, lane 1 = valid count

    # resizeNormalize: (x - 0.5) / 0.5 == 2*x - 1  (f32 VPU)
    x = x_ref[0] * 2.0 - 1.0                                        # (1, FEAT)

    # Encoder: bf16 MXU operands, f32 accumulate; tanh stays f32 (EUP).
    h = jnp.dot(x.astype(jnp.bfloat16), we_ref[...],
                preferred_element_type=jnp.float32) + be_ref[...]   # (1, H_PAD)
    h = jnp.tanh(h)

    # Per-timestep decoder input: sublane-broadcast add, kept entirely in VMEM.
    dec_in = h + pe_ref[...]                                        # (T_DEC, H_PAD)

    # Classifier head.
    logits = jnp.dot(dec_in.astype(jnp.bfloat16), wc_ref[...],
                     preferred_element_type=jnp.float32) + bc_ref[...]  # (T_DEC, C_PAD)

    # Cross-entropy with ignore_index=PAD over the T_DEC rows of this sample.
    col = jax.lax.broadcasted_iota(jnp.int32, (T_DEC, C_PAD), 1)
    logits = jnp.where(col < NUM_CLASSES, logits, -1e30)            # drop padded classes
    m = jnp.max(logits, axis=1, keepdims=True)                      # (T_DEC, 1)
    lse = m + jnp.log(jnp.sum(jnp.exp(logits - m), axis=1, keepdims=True))
    tgt = tgt_ref[0]                                                # (T_DEC, 1) int32
    correct = jnp.sum(jnp.where(col == tgt, logits, 0.0),
                      axis=1, keepdims=True)                        # (T_DEC, 1)
    valid = (tgt != PAD_IDX).astype(jnp.float32)                    # (T_DEC, 1)
    loss_sum = jnp.sum((lse - correct) * valid, axis=(0, 1), keepdims=True)  # (1, 1)
    count = jnp.sum(valid, axis=(0, 1), keepdims=True)                       # (1, 1)

    lane = jax.lax.broadcasted_iota(jnp.int32, (1, 128), 1)
    o_ref[0] = jnp.where(lane == 0, loss_sum,
                         jnp.where(lane == 1, count, 0.0))          # (1, 128)


# -------------------- parameters (deterministic, synthetic, pre-padded) --------------------

def init_params(key):
    k1, k2, k3 = jax.random.split(key, 3)
    w_enc = jnp.zeros((FEAT, H_PAD), jnp.float32).at[:, :HIDDEN].set(
        jax.random.normal(k1, (FEAT, HIDDEN), jnp.float32) * 0.02)
    pos_emb = jnp.zeros((T_DEC, H_PAD), jnp.float32).at[:, :HIDDEN].set(
        jax.random.normal(k2, (T_DEC, HIDDEN), jnp.float32) * 0.02)
    w_cls = jnp.zeros((H_PAD, C_PAD), jnp.float32).at[:HIDDEN, :NUM_CLASSES].set(
        jax.random.normal(k3, (HIDDEN, NUM_CLASSES), jnp.float32) * 0.02)
    return dict(
        # matmul weights stored bf16: halves weight DMA, MXU-native dtype
        w_enc=w_enc.astype(jnp.bfloat16),
        b_enc=jnp.zeros((1, H_PAD), jnp.float32),
        pos_emb=pos_emb,
        w_cls=w_cls.astype(jnp.bfloat16),
        b_cls=jnp.zeros((1, C_PAD), jnp.float32),
    )


# -------------------- OCRLoss.forward --------------------

def ocr_loss_forward(params, images, targets):
    B = images.shape[0]
    # T.Resize((32, 100)) bilinear — kept as plain-JAX glue.
    # TODO(synk): bilinear resize has no dedicated Pallas kernel here (glue op).
    resized = jax.image.resize(images, (B, IN_CH, IMG_H, IMG_W), method="bilinear")
    x3d = resized.reshape(B, 1, FEAT).astype(jnp.float32)     # lane-dense (3200=25*128)
    tgt3d = targets.reshape(B, T_DEC, 1).astype(jnp.int32)

    # TODO(synk): the full TRBA model (ResNet backbone + BiLSTM + attention decoder,
    # weights from TRBA-PR.pth) cannot be reproduced without the checkpoint; a
    # deterministic synthetic encoder + per-timestep classifier stands in, fused with
    # the normalize and the cross-entropy into a single Pallas kernel.
    partials = pl.pallas_call(
        _fused_ocr_loss_kernel,
        out_shape=jax.ShapeDtypeStruct((B, 1, 128), jnp.float32),
        grid=(B,),
        in_specs=[
            pl.BlockSpec((1, 1, FEAT), lambda b: (b, 0, 0)),      # per-sample image
            pl.BlockSpec((FEAT, H_PAD), lambda b: (0, 0)),        # w_enc (resident)
            pl.BlockSpec((1, H_PAD), lambda b: (0, 0)),           # b_enc
            pl.BlockSpec((T_DEC, H_PAD), lambda b: (0, 0)),       # pos_emb
            pl.BlockSpec((H_PAD, C_PAD), lambda b: (0, 0)),       # w_cls
            pl.BlockSpec((1, C_PAD), lambda b: (0, 0)),           # b_cls
            pl.BlockSpec((1, T_DEC, 1), lambda b: (b, 0, 0)),     # per-sample targets
        ],
        out_specs=pl.BlockSpec((1, 1, 128), lambda b: (b, 0, 0)),
        compiler_params=pltpu.CompilerParams(
            dimension_semantics=("parallel",)),                   # v7x: shard batch over TCs
    )(x3d, params["w_enc"], params["b_enc"], params["pos_emb"],
      params["w_cls"], params["b_cls"], tgt3d)

    # CrossEntropyLoss(ignore_index=PAD, reduction='mean'): sum / count
    # (nan if every target is PAD, matching PyTorch semantics).
    loss = jnp.sum(partials[:, 0, 0]) / jnp.sum(partials[:, 0, 1])
    return loss


# -------------------- demo --------------------

if __name__ == "__main__":
    key = jax.random.PRNGKey(0)
    kimg, klab, kparam = jax.random.split(key, 3)
    B = 2

    # arbitrary-sized input images (NCHW); forward resizes them to (32, 100)
    images = jax.random.uniform(kimg, (B, IN_CH, 64, 200), jnp.float32)

    # synthesize Converter.encode output: target = labels_index[:, 1:] of shape (B, 26)
    lengths = jnp.array([7, 12], jnp.int32)
    chars = jax.random.randint(klab, (B, T_DEC), 3, NUM_CLASSES)
    pos = jnp.arange(T_DEC)[None, :]
    targets = jnp.where(
        pos < lengths[:, None], chars,
        jnp.where(pos == lengths[:, None], EOS_IDX, PAD_IDX)).astype(jnp.int32)

    params = init_params(kparam)
    loss = jax.jit(ocr_loss_forward)(params, images, targets)
    jax.block_until_ready(loss)
    print("KERNEL_OK")
</pallas_src>

<mosaic_0001>
module attributes {stable_mosaic.version = 11 : i64} {
  func.func @_fused_ocr_loss_kernel(%arg0: i32, %arg1: memref<1x1x3200xf32, #tpu.memory_space<vmem>>, %arg2: memref<3200x128xbf16, #tpu.memory_space<vmem>>, %arg3: memref<1x128xf32, #tpu.memory_space<vmem>>, %arg4: memref<26x128xf32, #tpu.memory_space<vmem>>, %arg5: memref<128x128xbf16, #tpu.memory_space<vmem>>, %arg6: memref<1x128xf32, #tpu.memory_space<vmem>>, %arg7: memref<1x26x1xi32, #tpu.memory_space<vmem>>, %arg8: memref<1x1x128xf32, #tpu.memory_space<vmem>>) attributes {dimension_semantics = [#tpu.dimension_semantics<parallel>], iteration_bounds = array<i64: 2>, scalar_prefetch = 0 : i64, scratch_operands = 0 : i64, tpu.core_type = #tpu.core_type<tc>, window_params = [{transform_indices = @transform_0, window_bounds = array<i64: 1, 1, 3200>}, {pipeline_mode = #tpu.pipeline_mode<synchronous>, transform_indices = @transform_1, window_bounds = array<i64: 3200, 128>}, {pipeline_mode = #tpu.pipeline_mode<synchronous>, transform_indices = @transform_2, window_bounds = array<i64: 1, 128>}, {pipeline_mode = #tpu.pipeline_mode<synchronous>, transform_indices = @transform_3, window_bounds = array<i64: 26, 128>}, {pipeline_mode = #tpu.pipeline_mode<synchronous>, transform_indices = @transform_4, window_bounds = array<i64: 128, 128>}, {pipeline_mode = #tpu.pipeline_mode<synchronous>, transform_indices = @transform_5, window_bounds = array<i64: 1, 128>}, {transform_indices = @transform_6, window_bounds = array<i64: 1, 26, 1>}, {transform_indices = @transform_7, window_bounds = array<i64: 1, 1, 128>}]} {
    %c0 = arith.constant 0 : index
    %c0_0 = arith.constant 0 : index
    %c0_1 = arith.constant 0 : index
    %0 = vector.load %arg1[%c0, %c0_0, %c0_1] : memref<1x1x3200xf32, #tpu.memory_space<vmem>>, vector<1x1x3200xf32>
    %1 = vector.shape_cast %0 : vector<1x1x3200xf32> to vector<1x3200xf32>
    %cst = arith.constant 2.000000e+00 : f32
    %2 = vector.broadcast %cst : f32 to vector<1x3200xf32>
    %3 = arith.mulf %1, %2 : vector<1x3200xf32>
    %cst_2 = arith.constant 1.000000e+00 : f32
    %4 = vector.broadcast %cst_2 : f32 to vector<1x3200xf32>
    %5 = arith.subf %3, %4 : vector<1x3200xf32>
    %6 = arith.truncf %5 : vector<1x3200xf32> to vector<1x3200xbf16>
    %c0_3 = arith.constant 0 : index
    %c0_4 = arith.constant 0 : index
    %7 = vector.load %arg2[%c0_3, %c0_4] : memref<3200x128xbf16, #tpu.memory_space<vmem>>, vector<3200x128xbf16>
    %cst_5 = arith.constant dense<0.000000e+00> : vector<1x128xf32>
    %8 = tpu.matmul %6, %7, %cst_5 {dimension_numbers = #tpu.dot_dimension_numbers<[1], [0], [0], [1], [0, 0, 1, 1], [], []>} : vector<1x3200xbf16>, vector<3200x128xbf16>, vector<1x128xf32> -> vector<1x128xf32>
    %c0_6 = arith.constant 0 : index
    %c0_7 = arith.constant 0 : index
    %9 = vector.load %arg3[%c0_6, %c0_7] : memref<1x128xf32, #tpu.memory_space<vmem>>, vector<1x128xf32>
    %10 = arith.addf %8, %9 : vector<1x128xf32>
    %11 = math.tanh %10 : vector<1x128xf32>
    %c0_8 = arith.constant 0 : index
    %c0_9 = arith.constant 0 : index
    %12 = vector.load %arg4[%c0_8, %c0_9] : memref<26x128xf32, #tpu.memory_space<vmem>>, vector<26x128xf32>
    %13 = vector.broadcast %11 : vector<1x128xf32> to vector<26x128xf32>
    %14 = arith.addf %13, %12 : vector<26x128xf32>
    %15 = arith.truncf %14 : vector<26x128xf32> to vector<26x128xbf16>
    %c0_10 = arith.constant 0 : index
    %c0_11 = arith.constant 0 : index
    %16 = vector.load %arg5[%c0_10, %c0_11] : memref<128x128xbf16, #tpu.memory_space<vmem>>, vector<128x128xbf16>
    %cst_12 = arith.constant dense<0.000000e+00> : vector<26x128xf32>
    %17 = tpu.matmul %15, %16, %cst_12 {dimension_numbers = #tpu.dot_dimension_numbers<[1], [0], [0], [1], [0, 0, 1, 1], [], []>} : vector<26x128xbf16>, vector<128x128xbf16>, vector<26x128xf32> -> vector<26x128xf32>
    %c0_13 = arith.constant 0 : index
    %c0_14 = arith.constant 0 : index
    %18 = vector.load %arg6[%c0_13, %c0_14] : memref<1x128xf32, #tpu.memory_space<vmem>>, vector<1x128xf32>
    %19 = vector.broadcast %18 : vector<1x128xf32> to vector<26x128xf32>
    %20 = arith.addf %17, %19 : vector<26x128xf32>
    %21 = tpu.iota {dimensions = array<i32: 1>} : vector<26x128xi32>
    %c40_i32 = arith.constant 40 : i32
    %22 = vector.broadcast %c40_i32 : i32 to vector<26x128xi32>
    %23 = arith.cmpi slt, %21, %22 : vector<26x128xi32>
    %cst_15 = arith.constant -1.000000e+30 : f32
    %24 = vector.broadcast %cst_15 : f32 to vector<26x128xf32>
    %25 = arith.select %23, %20, %24 : vector<26x128xi1>, vector<26x128xf32>
    %cst_16 = arith.constant dense<0xFF800000> : vector<26xf32>
    %26 = vector.multi_reduction <maximumf>, %25, %cst_16 [1] : vector<26x128xf32> to vector<26xf32>
    %27 = vector.shape_cast %26 : vector<26xf32> to vector<26x1xf32>
    %28 = vector.broadcast %27 : vector<26x1xf32> to vector<26x128xf32>
    %29 = arith.subf %25, %28 : vector<26x128xf32>
    %30 = math.exp %29 : vector<26x128xf32>
    %cst_17 = arith.constant dense<0.000000e+00> : vector<26xf32>
    %31 = vector.multi_reduction <add>, %30, %cst_17 [1] : vector<26x128xf32> to vector<26xf32>
    %32 = vector.shape_cast %31 : vector<26xf32> to vector<26x1xf32>
    %33 = math.log %32 : vector<26x1xf32>
    %34 = arith.addf %27, %33 : vector<26x1xf32>
    %c0_18 = arith.constant 0 : index
    %c0_19 = arith.constant 0 : index
    %c0_20 = arith.constant 0 : index
    %35 = vector.load %arg7[%c0_18, %c0_19, %c0_20] : memref<1x26x1xi32, #tpu.memory_space<vmem>>, vector<1x26x1xi32>
    %36 = vector.shape_cast %35 : vector<1x26x1xi32> to vector<26x1xi32>
    %37 = vector.broadcast %36 : vector<26x1xi32> to vector<26x128xi32>
    %38 = arith.cmpi eq, %21, %37 : vector<26x128xi32>
    %cst_21 = arith.constant 0.000000e+00 : f32
    %39 = vector.broadcast %cst_21 : f32 to vector<26x128xf32>
    %40 = arith.select %38, %25, %39 : vector<26x128xi1>, vector<26x128xf32>
    %cst_22 = arith.constant dense<0.000000e+00> : vector<26xf32>
    %41 = vector.multi_reduction <add>, %40, %cst_22 [1] : vector<26x128xf32> to vector<26xf32>
    %42 = vector.shape_cast %41 : vector<26xf32> to vector<26x1xf32>
    %c0_i32 = arith.constant 0 : i32
    %43 = vector.broadcast %c0_i32 : i32 to vector<26x1xi32>
    %44 = arith.cmpi ne, %36, %43 : vector<26x1xi32>
    %45 = arith.extui %44 : vector<26x1xi1> to vector<26x1xi32>
    %46 = arith.sitofp %45 : vector<26x1xi32> to vector<26x1xf32>
    %47 = arith.subf %34, %42 : vector<26x1xf32>
    %48 = arith.mulf %47, %46 : vector<26x1xf32>
    %49 = vector.shape_cast %48 : vector<26x1xf32> to vector<1x26x1xf32>
    %cst_23 = arith.constant dense<0.000000e+00> : vector<1xf32>
    %50 = vector.multi_reduction <add>, %49, %cst_23 [1, 2] : vector<1x26x1xf32> to vector<1xf32>
    %51 = vector.shape_cast %50 : vector<1xf32> to vector<1x1x1xf32>
    %52 = vector.extract %51[0, 0, 0] : f32 from vector<1x1x1xf32>
    %53 = vector.broadcast %52 : f32 to vector<1x1xf32>
    %54 = vector.shape_cast %46 : vector<26x1xf32> to vector<1x26x1xf32>
    %cst_24 = arith.constant dense<0.000000e+00> : vector<1xf32>
    %55 = vector.multi_reduction <add>, %54, %cst_24 [1, 2] : vector<1x26x1xf32> to vector<1xf32>
    %56 = vector.shape_cast %55 : vector<1xf32> to vector<1x1x1xf32>
    %57 = vector.extract %56[0, 0, 0] : f32 from vector<1x1x1xf32>
    %58 = vector.broadcast %57 : f32 to vector<1x1xf32>
    %59 = tpu.iota {dimensions = array<i32: 1>} : vector<1x128xi32>
    %c0_i32_25 = arith.constant 0 : i32
    %60 = vector.broadcast %c0_i32_25 : i32 to vector<1x128xi32>
    %61 = arith.cmpi eq, %59, %60 : vector<1x128xi32>
    %c1_i32 = arith.constant 1 : i32
    %62 = vector.broadcast %c1_i32 : i32 to vector<1x128xi32>
    %63 = arith.cmpi eq, %59, %62 : vector<1x128xi32>
    %cst_26 = arith.constant 0.000000e+00 : f32
    %64 = vector.shape_cast %58 : vector<1x1xf32> to vector<1x1xf32>
    %65 = vector.broadcast %64 : vector<1x1xf32> to vector<1x128xf32>
    %66 = vector.broadcast %cst_26 : f32 to vector<1x128xf32>
    %67 = arith.select %63, %65, %66 : vector<1x128xi1>, vector<1x128xf32>
    %68 = vector.shape_cast %53 : vector<1x1xf32> to vector<1x1xf32>
    %69 = vector.broadcast %68 : vector<1x1xf32> to vector<1x128xf32>
    %70 = arith.select %61, %69, %67 : vector<1x128xi1>, vector<1x128xf32>
    %c0_27 = arith.constant 0 : index
    %c0_28 = arith.constant 0 : index
    %c0_29 = arith.constant 0 : index
    %71 = vector.load %arg8[%c0_27, %c0_28, %c0_29] : memref<1x1x128xf32, #tpu.memory_space<vmem>>, vector<1x1x128xf32>
    %72 = vector.shape_cast %71 : vector<1x1x128xf32> to vector<1x128xf32>
    %73 = vector.shape_cast %70 : vector<1x128xf32> to vector<1x1x128xf32>
    tpu.vector_store %arg8[%c0_27, %c0_28, %c0_29], %73 {strides = array<i32>} : memref<1x1x128xf32, #tpu.memory_space<vmem>>, vector<1x1x128xf32>,
    return
  }
  func.func @transform_0(%arg0: i32) -> (i32, i32, i32) {
    %c0_i32 = arith.constant 0 : i32
    %c0_i32_0 = arith.constant 0 : i32
    %c0_i32_1 = arith.constant 0 : i32
    return %arg0, %c0_i32, %c0_i32_0 : i32, i32, i32
  }
  func.func @transform_1(%arg0: i32) -> (i32, i32) {
    %c0_i32 = arith.constant 0 : i32
    %c0_i32_0 = arith.constant 0 : i32
    %c0_i32_1 = arith.constant 0 : i32
    return %c0_i32, %c0_i32_0 : i32, i32
  }
  func.func @transform_2(%arg0: i32) -> (i32, i32) {
    %c0_i32 = arith.constant 0 : i32
    %c0_i32_0 = arith.constant 0 : i32
    %c0_i32_1 = arith.constant 0 : i32
    return %c0_i32, %c0_i32_0 : i32, i32
  }
  func.func @transform_3(%arg0: i32) -> (i32, i32) {
    %c0_i32 = arith.constant 0 : i32
    %c0_i32_0 = arith.constant 0 : i32
    %c0_i32_1 = arith.constant 0 : i32
    return %c0_i32, %c0_i32_0 : i32, i32
  }
  func.func @transform_4(%arg0: i32) -> (i32, i32) {
    %c0_i32 = arith.constant 0 : i32
    %c0_i32_0 = arith.constant 0 : i32
    %c0_i32_1 = arith.constant 0 : i32
    return %c0_i32, %c0_i32_0 : i32, i32
  }
  func.func @transform_5(%arg0: i32) -> (i32, i32) {
    %c0_i32 = arith.constant 0 : i32
    %c0_i32_0 = arith.constant 0 : i32
    %c0_i32_1 = arith.constant 0 : i32
    return %c0_i32, %c0_i32_0 : i32, i32
  }
  func.func @transform_6(%arg0: i32) -> (i32, i32, i32) {
    %c0_i32 = arith.constant 0 : i32
    %c0_i32_0 = arith.constant 0 : i32
    %c0_i32_1 = arith.constant 0 : i32
    return %arg0, %c0_i32, %c0_i32_0 : i32, i32, i32
  }
  func.func @transform_7(%arg0: i32) -> (i32, i32, i32) {
    %c0_i32 = arith.constant 0 : i32
    %c0_i32_0 = arith.constant 0 : i32
    %c0_i32_1 = arith.constant 0 : i32
    return %arg0, %c0_i32, %c0_i32_0 : i32, i32, i32
  }
}

</mosaic_0001>

<bundles_post_ra>
// kernel: ocr_loss_forward.1
= control target key start
LH: loop header
LB: loop body
LE: loop exit
PB: predicated region body
PF: predicated region fallthrough
CT: control target
= control target key end

     0   :  { %12 = vsyncpa [#allocation3], 0  ;;  %s3837_s24 = smov 0   ;;  %s3996_s0 = inlined_call_operand.vmem [shape: f32[2,1,3200], index: 0, kind: input, shape index: {}]   ;;  %s3997_s1 = inlined_call_operand.hbm [shape: bf16[3200,128], index: 1, kind: input, shape index: {}]   ;;  %s3998_s2 = inlined_call_operand.vmem [shape: f32[1,128], index: 2, kind: input, shape index: {}]   ;;  %s3999_s3 = inlined_call_operand.vmem [shape: f32[26,128], index: 3, kind: input, shape index: {}]   ;;  %s4000_s4 = inlined_call_operand.vmem [shape: bf16[128,128], index: 4, kind: input, shape index: {}]   ;;  %s4001_s5 = inlined_call_operand.vmem [shape: f32[1,128], index: 5, kind: input, shape index: {}]   ;;  %s4002_s6 = inlined_call_operand.vmem [shape: s32[2,26,1], index: 6, kind: input, shape index: {}]   ;;  %s4003_s7 = inlined_call_operand.vmem [shape: f32[2,1,128], index: 7, kind: output, shape index: {}]  }
   0x1 LB: > { %s217_s27 = sshll.u32 %s3997_s1, 4  ;;  %s2640_s28 = sadd.s32 4294967295, %s3790_s24   ;;  %s3790_s24 = sphi %s3837_s24, %s18_s24   ;;  %s218_s27 = int_to_ptr.hbm [resolvable:$true] %s217_s27 }
   0x2   : > { %p2642_p0 = scmp.ge.s32.totalorder %s3790_s24, 1  ;;  %p206_p1 = scmp.lt.s32.totalorder %s3790_s24, 3 }
   0x3   : > { %p3713_p2 = scmp.eq.s32.totalorder %s2640_s28, 0  ;;  %s3792_s29 = smov [#allocation2]  }
   0x4   : > { %p207_p3 = pnand %p2642_p0, %p206_p1  ;;  %s219_s30 = sshll.u32 %s3792_s29, 4  ;;  %s220_s30 = int_to_ptr.vmem [resolvable:$true] %s219_s30 }
   0x5   : > { %s3793_s8 = smov 64   ;;  %s3794_s9 = smov 4  }
   0x6   : > { %p3709_p4 = pneg %p207_p3  ;;  %262 = sbr.rel (%p207_p3) target bundleno = 993 (0x3e1), region = 48 }
   0x8   : > { %p3710_p5 = pnand %p3713_p2, %p3709_p4 }
   0xa   : > { %3712 = dma.hbm_to_vmem [thread:$0]  (!%p3710_p5), %s218_s27, 25600, %s220_s30, [#allocation3], %s3793_s8, %s3793_s8, %s3794_s9  }
   0xb   : > { %3785 = dma.done.wait (%p3713_p2), [#allocation3], 25600  }
   0xc   : > { %3787 = vsyncadd (%p3713_p2), [#allocation3], 4294941696  ;;  %p297_p6 = scmp.lt.s32.totalorder %s2640_s28, 1  ;;  %v3507_v0 = vld [vmem:[#allocation2 + $0x78] sm:$0xff]  ;;  %v3506_v2 = vld [vmem:[#allocation2 + $0x70] sm:$0xff]  ;;  %vm2438_vm1 = vcmask 1041408  }
   0xd   : > { %v3499_v1 = vld [vmem:[#allocation2 + $0x38] sm:$0xff]  ;;  %2014 = vmatpush.bf16.msra.mxu2 %v3507_v0  ;;  %v3498_v3 = vld [vmem:[#allocation2 + $0x30] sm:$0xff]  ;;  %v3505_v5 = vld [vmem:[#allocation2 + $0x68] sm:$0xff]  ;;  %vm2528_vm8 = vcmask 7168   ;;  %vm2534_vm11 = vcmask 1024  }
   0xe   : > { %2001 = vmatpush.bf16.msra.mxu0 %v3499_v1  ;;  %s4005_s28 = smov (!%p297_p6, %s2640_s28), 1  ;;  %v3523_v4 = vld [vmem:[#allocation2 + $0xf8] sm:$0xff]  ;;  %v3497_v6 = vld [vmem:[#allocation2 + $0x28] sm:$0xff]  ;;  %v3522_v7 = vld [vmem:[#allocation2 + $0xf0] sm:$0xff] }
   0xf   : > { %2040 = vmatpush.bf16.msra.mxu3 %v3523_v4  ;;  %s3700_s10 = smul.u32 25, %s4005_s28  ;;  %v3539_v8 = vld [vmem:[#allocation2 + $0x178] sm:$0xff]  ;;  %v3504_v9 = vld [vmem:[#allocation2 + $0x60] sm:$0xff]  ;;  %v3521_v11 = vld [vmem:[#allocation2 + $0xe8] sm:$0xff]  ;;  %s3491_s11 = sshll.u32 %s4005_s28, 5 }
  0x10   : > { %v3496_v10 = vld [vmem:[#allocation2 + $0x20] sm:$0xff]  ;;  %2066 = vmatpush.bf16.msra.mxu1 %v3539_v8  ;;  %v3538_v12 = vld [vmem:[#allocation2 + $0x170] sm:$0xff]  ;;  %v3503_v13 = vld [vmem:[#allocation2 + $0x58] sm:$0xff]  ;;  %s3924_s14 = scalar_lea.vmem %s4002_s6, %s3491_s11  ;;  %s308_s8 = scalar_lea.vmem %s4003_s7, %s4005_s28 }
  0x11   : > { %2015 = vmatpush.bf16.msra.mxu2 %v3506_v2  ;;  %s3854_s13 = scalar_lea.vmem %s3996_s0, %s3700_s10  ;;  %v3495_v14 = vld [vmem:[#allocation2 + $0x18] sm:$0xff]  ;;  %v3520_v16 = vld [vmem:[#allocation2 + $0xe0] sm:$0xff]  ;;  %v3537_v18 = vld [vmem:[#allocation2 + $0x168] sm:$0xff] }
  0x12   : > { %2002 = vmatpush.bf16.msra.mxu0 %v3498_v3  ;;  %v309_v15 = vld [vmem:[%s3854_s13] sm:$0xff]  ;;  %v3502_v19 = vld [vmem:[#allocation2 + $0x50] sm:$0xff]  ;;  %v3519_v21 = vld [vmem:[#allocation2 + $0xd8] sm:$0xff] }
  0x13   : > { %2041 = vmatpush.bf16.msra.mxu3 %v3522_v7  ;;  %v313_v17 = vmul.f32 2.0, %v309_v15  ;;  %v3494_v20 = vld [vmem:[#allocation2 + $0x10] sm:$0xff]  ;;  %v3536_v23 = vld [vmem:[#allocation2 + $0x160] sm:$0xff]  ;;  %v3501_v24 = vld [vmem:[#allocation2 + $0x48] sm:$0xff] }
  0x14   : > { %2067 = vmatpush.bf16.msra.mxu1 %v3538_v12  ;;  %v3493_v25 = vld [vmem:[#allocation2 + $0x8] sm:$0xff]  ;;  %v3518_v26 = vld [vmem:[#allocation2 + $0xd0] sm:$0xff]  ;;  %v3535_v29 = vld [vmem:[#allocation2 + $0x158] sm:$0xff] }
  0x15   : > { %2016 = vmatpush.bf16.msra.mxu2 %v3505_v5  ;;  %v3857_v22 = vadd.f32 -1.0, %v313_v17  ;;  %v3500_v30 = vld [vmem:[#allocation2 + $0x40] sm:$0xff]  ;;  %v3515_v32 = vld [vmem:[#allocation2 + $0xb8] sm:$0xff]  ;;  %v3517_v34 = vld [vmem:[#allocation2 + $0xc8] sm:$0xff] }
  0x16   : > { %2003 = vmatpush.bf16.msra.mxu0 %v3497_v6  ;;  %v3492_v31 = vld [vmem:[#allocation2] sm:$0xff]  ;;  %v3531_v33 = vld [vmem:[#allocation2 + $0x138] sm:$0xff]  ;;  %v3534_v37 = vld [vmem:[#allocation2 + $0x150] sm:$0xff] }
  0x17   : > { %2042 = vmatpush.bf16.msra.mxu3 %v3521_v11  ;;  %v326_v27 = vperm.slane %v3857_v22, 1  ;;  %v325_v28 = vperm.slane %v3857_v22, 0  ;;  %v3514_v38 = vld [vmem:[#allocation2 + $0xb0] sm:$0xff]  ;;  %v3516_v40 = vld [vmem:[#allocation2 + $0xc0] sm:$0xff]  ;;  %v328_v41 = vperm.slane %v3857_v22, 3  ;;  %v3533_v42 = vld [vmem:[#allocation2 + $0x148] sm:$0xff] }
  0x18   : > { %2068 = vmatpush.bf16.msra.mxu1 %v3537_v18  ;;  %v3530_v39 = vld [vmem:[#allocation2 + $0x130] sm:$0xff]  ;;  %v3555_v43 = vld [vmem:[#allocation2 + $0x1f8] sm:$0xff]  ;;  %v3513_v44 = vld [vmem:[#allocation2 + $0xa8] sm:$0xff]  ;;  %v330_v50 = vperm.slane %v3857_v22, 5  ;;  %v327_v3 = vperm.slane %v3857_v22, 2  ;;  %v329_v4 = vperm.slane %v3857_v22, 4 }
  0x19   : > { %2017 = vmatpush.bf16.msra.mxu2 %v3504_v9  ;;  %v376_v35 = vpack.c.bf16 %v326_v27, %v326_v27  ;;  %v375_v36 = vpack.c.bf16 %v325_v28, %v325_v28  ;;  %v3529_v45 = vld [vmem:[#allocation2 + $0x128] sm:$0xff]  ;;  %v378_v46 = vpack.c.bf16 %v328_v41, %v328_v41  ;;  %v3532_v47 = vld [vmem:[#allocation2 + $0x140] sm:$0xff]  ;;  %v3554_v48 = vld [vmem:[#allocation2 + $0x1f0] sm:$0xff]  ;;  %v332_v18 = vperm.slane %v3857_v22, 7 }
  0x1a   : > { %2004 = vmatpush.bf16.msra.mxu0 %v3496_v10  ;;  %v3571_v49 = vld [vmem:[#allocation2 + $0x278] sm:$0xff]  ;;  %v3512_v51 = vld [vmem:[#allocation2 + $0xa0] sm:$0xff]  ;;  %v380_v53 = vpack.c.bf16 %v330_v50, %v330_v50  ;;  %v3553_v54 = vld [vmem:[#allocation2 + $0x1e8] sm:$0xff]  ;;  %v377_v11 = vpack.c.bf16 %v327_v3, %v327_v3  ;;  %v379_v12 = vpack.c.bf16 %v329_v4, %v329_v4 }
  0x1b   : > { %2043 = vmatpush.bf16.msra.mxu3 %v3520_v16  ;;  %v3528_v52 = vld [vmem:[#allocation2 + $0x120] sm:$0xff]  ;;  %v3570_v55 = vld [vmem:[#allocation2 + $0x270] sm:$0xff]  ;;  %v3511_v56 = vld [vmem:[#allocation2 + $0x98] sm:$0xff] }
  0x1c   : > { %2069 = vmatpush.bf16.msra.mxu1 %v3536_v23  ;;  %v3527_v57 = vld [vmem:[#allocation2 + $0x118] sm:$0xff]  ;;  %v3552_v58 = vld [vmem:[#allocation2 + $0x1e0] sm:$0xff]  ;;  %v3569_v59 = vld [vmem:[#allocation2 + $0x268] sm:$0xff] }
  0x1d   : > { %2018 = vmatpush.bf16.msra.mxu2 %v3503_v13  ;;  %v3510_v60 = vld [vmem:[#allocation2 + $0x90] sm:$0xff]  ;;  %v3551_v62 = vld [vmem:[#allocation2 + $0x1d8] sm:$0xff]  ;;  %v3568_v63 = vld [vmem:[#allocation2 + $0x260] sm:$0xff] }
  0x1e   : > { %2005 = vmatpush.bf16.msra.mxu0 %v3495_v14  ;;  %v3526_v61 = vld [vmem:[#allocation2 + $0x110] sm:$0xff]  ;;  %v3509_v0 = vld [vmem:[#allocation2 + $0x88] sm:$0xff]  ;;  %v3567_v5 = vld [vmem:[#allocation2 + $0x258] sm:$0xff] }
  0x1f   : > { %2044 = vmatpush.bf16.msra.mxu3 %v3519_v21  ;;  %v3525_v1 = vld [vmem:[#allocation2 + $0x108] sm:$0xff]  ;;  %v3550_v2 = vld [vmem:[#allocation2 + $0x1d0] sm:$0xff]  ;;  %v3508_v6 = vld [vmem:[#allocation2 + $0x80] sm:$0xff] }
  0x20   : > { %2070 = vmatpush.bf16.msra.mxu1 %v3535_v29  ;;  %v3524_v7 = vld [vmem:[#allocation2 + $0x100] sm:$0xff]  ;;  %v3547_v8 = vld [vmem:[#allocation2 + $0x1b8] sm:$0xff]  ;;  %v3549_v10 = vld [vmem:[#allocation2 + $0x1c8] sm:$0xff] }
  0x21   : > { %2019 = vmatpush.bf16.msra.mxu2 %v3502_v19  ;;  %v3563_v9 = vld [vmem:[#allocation2 + $0x238] sm:$0xff]  ;;  %v3566_v13 = vld [vmem:[#allocation2 + $0x250] sm:$0xff]  ;;  %v310_v16 = vld [vmem:[%s3854_s13 + $0x8] sm:$0xff] }
  0x22   : > { %2006 = vmatpush.bf16.msra.mxu0 %v3494_v20  ;;  %v3546_v14 = vld [vmem:[#allocation2 + $0x1b0] sm:$0xff]  ;;  %v3548_v17 = vld [vmem:[#allocation2 + $0x1c0] sm:$0xff]  ;;  %v3565_v19 = vld [vmem:[#allocation2 + $0x248] sm:$0xff]  ;;  %v314_v20 = vmul.f32 2.0, %v310_v16 }
  0x23   : > { %2045 = vmatpush.bf16.msra.mxu3 %v3518_v26  ;;  %v3562_v15 = vld [vmem:[#allocation2 + $0x230] sm:$0xff]  ;;  %v3587_v21 = vld [vmem:[#allocation2 + $0x2f8] sm:$0xff]  ;;  %v3545_v23 = vld [vmem:[#allocation2 + $0x1a8] sm:$0xff] }
  0x24   : > { %2071 = vmatpush.bf16.msra.mxu1 %v3534_v37  ;;  %v3564_v26 = vld [vmem:[#allocation2 + $0x240] sm:$0xff]  ;;  %v3867_v27 = vadd.f32 -1.0, %v314_v20  ;;  %v3586_v28 = vld [vmem:[#allocation2 + $0x2f0] sm:$0xff]  ;;  %v3603_v29 = vld [vmem:[#allocation2 + $0x378] sm:$0xff] }
  0x25   : > { %2020 = vmatpush.bf16.msra.mxu2 %v3501_v24  ;;  %v3561_v24 = vld [vmem:[#allocation2 + $0x228] sm:$0xff]  ;;  %v3559_v37 = vld [vmem:[#allocation2 + $0x218] sm:$0xff]  ;;  %v3558_v41 = vld [vmem:[#allocation2 + $0x210] sm:$0xff] }
  0x26   : > { %2007 = vmatpush.bf16.msra.mxu0 %v3493_v25  ;;  %v382_v25 = vpack.c.bf16 %v332_v18, %v332_v18  ;;  %v3540_v50 = vld [vmem:[#allocation2 + $0x180] sm:$0xff]  ;;  %v3618_v3 = vld [vmem:[#allocation2 + $0x3f0] sm:$0xff]  ;;  %v3635_v4 = vld [vmem:[#allocation2 + $0x478] sm:$0xff] }
  0x27   : > { %2046 = vmatpush.bf16.msra.mxu3 %v3517_v34  ;;  %v3585_v34 = vld [vmem:[#allocation2 + $0x2e8] sm:$0xff]  ;;  %v3590_v16 = vld [vmem:[#allocation2 + $0x310] sm:$0xff]  ;;  %v3632_v18 = vld [vmem:[#allocation2 + $0x460] sm:$0xff] }
  0x28   : > { %2072 = vmatpush.bf16.msra.mxu1 %v3533_v42  ;;  %v3583_v42 = vld [vmem:[#allocation2 + $0x2d8] sm:$0xff]  ;;  %v3589_v20 = vld [vmem:[#allocation2 + $0x308] sm:$0xff] }
  0x29   : > { %2021 = vmatpush.bf16.msra.mxu2 %v3500_v30  ;;  %v334_v30 = vperm.slane %v3867_v27, 1 }
  0x2a   : > { %2008 = vmatpush.bf16.msra.mxu0 %v3492_v31  ;;  %v3544_v31 = vld [vmem:[#allocation2 + $0x1a0] sm:$0xff] }
  0x2b   : > { %2047 = vmatpush.bf16.msra.mxu3 %v3516_v40  ;;  %v3542_v40 = vld [vmem:[#allocation2 + $0x190] sm:$0xff] }
  0x2c   : > { %2022 = vmatmul.bf16.vlgmr.msra.gmra.mxu2 %v376_v35  ;;  %2073 = vmatpush.bf16.msra.mxu1 %v3532_v47  ;;  %v3602_v35 = vld [vmem:[#allocation2 + $0x370] sm:$0xff]  ;;  %v331_v47 = vperm.slane %v3857_v22, 6 }
  0x2d   : > { %2027 = vmatpush.bf16.msrb.mxu2 %v3515_v32  ;;  %2009 = vmatmul.bf16.vlgmr.msra.gmra.mxu0 %v375_v36  ;;  %v3560_v32 = vld [vmem:[#allocation2 + $0x220] sm:$0xff]  ;;  %v3543_v36 = vld [vmem:[#allocation2 + $0x198] sm:$0xff]  ;;  %v3578_v22 = vld [vmem:[#allocation2 + $0x2b0] sm:$0xff] }
  0x2e   : > { %2053 = vmatpush.bf16.msrb.mxu0 %v3531_v33  ;;  %2048 = vmatmul.bf16.vlgmr.msra.gmra.mxu3 %v378_v46  ;;  %v384_v33 = vpack.c.bf16 %v334_v30, %v334_v30  ;;  %v3582_v46 = vld [vmem:[#allocation2 + $0x2d0] sm:$0xff]  ;;  %v3627_v30 = vld [vmem:[#allocation2 + $0x438] sm:$0xff] }
  0x2f   : > { %2092 = vmatpush.bf16.msrb.mxu3 %v3555_v43  ;;  %2074 = vmatmul.bf16.vlgmr.msra.gmra.mxu1 %v380_v53  ;;  %v3600_v43 = vld [vmem:[#allocation2 + $0x360] sm:$0xff]  ;;  %v3595_v53 = vld [vmem:[#allocation2 + $0x338] sm:$0xff] }
  0x30   : > { %2118 = vmatpush.bf16.msrb.mxu1 %v3571_v49  ;;  %v3599_v49 = vld [vmem:[#allocation2 + $0x358] sm:$0xff] }
  0x31   : > { %2028 = vmatpush.bf16.msrb.mxu2 %v3514_v38  ;;  %v3584_v38 = vld [vmem:[#allocation2 + $0x2e0] sm:$0xff] }
  0x32   : > { %2054 = vmatpush.bf16.msrb.mxu0 %v3530_v39  ;;  %v3601_v39 = vld [vmem:[#allocation2 + $0x368] sm:$0xff] }
  0x33   : > { %2093 = vmatpush.bf16.msrb.mxu3 %v3554_v48  ;;  %v333_v48 = vperm.slane %v3867_v27, 0 }
  0x34   : > { %2119 = vmatpush.bf16.msrb.mxu1 %v3570_v55  ;;  %v381_v55 = vpack.c.bf16 %v331_v47, %v331_v47 }
  0x35   : > { %2029 = vmatpush.bf16.msrb.mxu2 %v3513_v44  ;;  %v3541_v44 = vld [vmem:[#allocation2 + $0x188] sm:$0xff] }
  0x36   : > { %2055 = vmatpush.bf16.msrb.mxu0 %v3529_v45  ;;  %v3557_v45 = vld [vmem:[#allocation2 + $0x208] sm:$0xff] }
  0x37   : > { %2094 = vmatpush.bf16.msrb.mxu3 %v3553_v54  ;;  %v3581_v54 = vld [vmem:[#allocation2 + $0x2c8] sm:$0xff] }
  0x38   : > { %2120 = vmatpush.bf16.msrb.mxu1 %v3569_v59  ;;  %v3580_v59 = vld [vmem:[#allocation2 + $0x2c0] sm:$0xff] }
  0x39   : > { %2030 = vmatpush.bf16.msrb.mxu2 %v3512_v51  ;;  %v3556_v51 = vld [vmem:[#allocation2 + $0x200] sm:$0xff] }
  0x3a   : > { %2056 = vmatpush.bf16.msrb.mxu0 %v3528_v52  ;;  %v3579_v52 = vld [vmem:[#allocation2 + $0x2b8] sm:$0xff] }
  0x3b   : > { %2095 = vmatpush.bf16.msrb.mxu3 %v3552_v58  ;;  %v3594_v58 = vld [vmem:[#allocation2 + $0x330] sm:$0xff] }
  0x3c   : > { %2121 = vmatpush.bf16.msrb.mxu1 %v3568_v63  ;;  %v3577_v63 = vld [vmem:[#allocation2 + $0x2a8] sm:$0xff] }
  0x3d   : > { %2031 = vmatpush.bf16.msrb.mxu2 %v3511_v56  ;;  %v383_v56 = vpack.c.bf16 %v333_v48, %v333_v48  ;;  %v3650_v48 = vld [vmem:[#allocation2 + $0x4f0] sm:$0xff] }
  0x3e   : > { %2057 = vmatpush.bf16.msrb.mxu0 %v3527_v57  ;;  %v3598_v57 = vld [vmem:[#allocation2 + $0x350] sm:$0xff] }
  0x3f   : > { %2096 = vmatpush.bf16.msrb.mxu3 %v3551_v62  ;;  %v3619_v62 = vld [vmem:[#allocation2 + $0x3f8] sm:$0xff] }
  0x40   : > { %2122 = vmatpush.bf16.msrb.mxu1 %v3567_v5  ;;  %v338_v5 = vperm.slane %v3867_v27, 5 }
  0x41   : > { %2032 = vmatpush.bf16.msrb.mxu2 %v3510_v60  ;;  %v336_v60 = vperm.slane %v3867_v27, 3 }
  0x42   : > { %2058 = vmatpush.bf16.msrb.mxu0 %v3526_v61  ;;  %v3597_v61 = vld [vmem:[#allocation2 + $0x348] sm:$0xff] }
  0x43   : > { %2097 = vmatpush.bf16.msrb.mxu3 %v3550_v2  ;;  %v3596_v2 = vld [vmem:[#allocation2 + $0x340] sm:$0xff] }
  0x44   : > { %2123 = vmatpush.bf16.msrb.mxu1 %v3566_v13  ;;  %v3616_v13 = vld [vmem:[#allocation2 + $0x3e0] sm:$0xff] }
  0x45   : > { %2033 = vmatpush.bf16.msrb.mxu2 %v3509_v0  ;;  %v3593_v0 = vld [vmem:[#allocation2 + $0x328] sm:$0xff] }
  0x46   : > { %2059 = vmatpush.bf16.msrb.mxu0 %v3525_v1  ;;  %v386_v1 = vpack.c.bf16 %v336_v60, %v336_v60  ;;  %v3622_v60 = vld [vmem:[#allocation2 + $0x410] sm:$0xff] }
  0x47   : > { %2098 = vmatpush.bf16.msrb.mxu3 %v3549_v10  ;;  %v3634_v10 = vld [vmem:[#allocation2 + $0x470] sm:$0xff] }
  0x48   : > { %2124 = vmatpush.bf16.msrb.mxu1 %v3565_v19  ;;  %v3573_v19 = vld [vmem:[#allocation2 + $0x288] sm:$0xff] }
  0x49   : > { %2034 = vmatpush.bf16.msrb.mxu2 %v3508_v6  ;;  %v3576_v6 = vld [vmem:[#allocation2 + $0x2a0] sm:$0xff] }
  0x4a   : > { %2060 = vmatpush.bf16.msrb.mxu0 %v3524_v7  ;;  %v3592_v7 = vld [vmem:[#allocation2 + $0x320] sm:$0xff] }
  0x4b   : > { %2099 = vmatpush.bf16.msrb.mxu3 %v3548_v17  ;;  %v3615_v17 = vld [vmem:[#allocation2 + $0x3d8] sm:$0xff] }
  0x4c   : > { %2035 = vmatmul.bf16.vlgmr.msrb.gmra.mxu2 %v377_v11  ;;  %2125 = vmatpush.bf16.msrb.mxu1 %v3564_v26  ;;  %v3575_v11 = vld [vmem:[#allocation2 + $0x298] sm:$0xff]  ;;  %v3572_v26 = vld [vmem:[#allocation2 + $0x280] sm:$0xff] }
  0x4d   : > { %2079 = vmatpush.bf16.msra.mxu2 %v3547_v8  ;;  %2061 = vmatmul.bf16.vlgmr.msrb.gmra.mxu0 %v379_v12  ;;  %v388_v8 = vpack.c.bf16 %v338_v5, %v338_v5  ;;  %v3591_v12 = vld [vmem:[#allocation2 + $0x318] sm:$0xff]  ;;  %v3604_v5 = vld [vmem:[#allocation2 + $0x380] sm:$0xff] }
  0x4e   : > { %2105 = vmatpush.bf16.msra.mxu0 %v3563_v9  ;;  %2100 = vmatmul.bf16.vlgmr.msrb.gmra.mxu3 %v382_v25  ;;  %v3617_v9 = vld [vmem:[#allocation2 + $0x3e8] sm:$0xff]  ;;  %v3631_v25 = vld [vmem:[#allocation2 + $0x458] sm:$0xff] }
  0x4f   : > { %2144 = vmatpush.bf16.msra.mxu3 %v3587_v21  ;;  %2126 = vmatmul.bf16.vlgmr.msrb.gmra.mxu1 %v384_v33  ;;  %v3614_v21 = vld [vmem:[#allocation2 + $0x3d0] sm:$0xff] }
  0x50   : > { %2170 = vmatpush.bf16.msra.mxu1 %v3603_v29  ;;  %v3611_v29 = vld [vmem:[#allocation2 + $0x3b8] sm:$0xff] }
  0x51   : > { %2080 = vmatpush.bf16.msra.mxu2 %v3546_v14  ;;  %v3633_v14 = vld [vmem:[#allocation2 + $0x468] sm:$0xff] }
  0x52   : > { %2106 = vmatpush.bf16.msra.mxu0 %v3562_v15  ;;  %v3574_v15 = vld [vmem:[#allocation2 + $0x290] sm:$0xff] }
  0x53   : > { %2145 = vmatpush.bf16.msra.mxu3 %v3586_v28  ;;  %v3588_v28 = vld [vmem:[#allocation2 + $0x300] sm:$0xff] }
  0x54   : > { %2171 = vmatpush.bf16.msra.mxu1 %v3602_v35  ;;  %v3610_v35 = vld [vmem:[#allocation2 + $0x3b0] sm:$0xff] }
  0x55   : > { %2081 = vmatpush.bf16.msra.mxu2 %v3545_v23  ;;  %v335_v23 = vperm.slane %v3867_v27, 2 }
  0x56   : > { %2107 = vmatpush.bf16.msra.mxu0 %v3561_v24  ;;  %v337_v24 = vperm.slane %v3867_v27, 4 }
  0x57   : > { %2146 = vmatpush.bf16.msra.mxu3 %v3585_v34  ;;  %v3630_v34 = vld [vmem:[#allocation2 + $0x450] sm:$0xff] }
  0x58   : > { %2172 = vmatpush.bf16.msra.mxu1 %v3601_v39  ;;  %v387_v33 = vpack.c.bf16 %v337_v24, %v337_v24  ;;  %v340_v39 = vperm.slane %v3867_v27, 7 }
  0x59   : > { %2082 = vmatpush.bf16.msra.mxu2 %v3544_v31  ;;  %v3613_v31 = vld [vmem:[#allocation2 + $0x3c8] sm:$0xff] }
  0x5a   : > { %2108 = vmatpush.bf16.msra.mxu0 %v3560_v32  ;;  %v385_v32 = vpack.c.bf16 %v335_v23, %v335_v23  ;;  %v3682_v23 = vld [vmem:[#allocation2 + $0x5f0] sm:$0xff] }
  0x5b   : > { %2147 = vmatpush.bf16.msra.mxu3 %v3584_v38  ;;  %v3612_v38 = vld [vmem:[#allocation2 + $0x3c0] sm:$0xff] }
  0x5c   : > { %2173 = vmatpush.bf16.msra.mxu1 %v3600_v43  ;;  %v3609_v43 = vld [vmem:[#allocation2 + $0x3a8] sm:$0xff] }
  0x5d   : > { %2083 = vmatpush.bf16.msra.mxu2 %v3543_v36  ;;  %v3626_v36 = vld [vmem:[#allocation2 + $0x430] sm:$0xff] }
  0x5e   : > { %2109 = vmatpush.bf16.msra.mxu0 %v3559_v37  ;;  %v311_v37 = vld [vmem:[%s3854_s13 + $0x10] sm:$0xff] }
  0x5f   : > { %2148 = vmatpush.bf16.msra.mxu3 %v3583_v42  ;;  %v3651_v42 = vld [vmem:[#allocation2 + $0x4f8] sm:$0xff] }
  0x60   : > { %2174 = vmatpush.bf16.msra.mxu1 %v3599_v49  ;;  %v3667_v49 = vld [vmem:[#allocation2 + $0x578] sm:$0xff] }
  0x61   : > { %2084 = vmatpush.bf16.msra.mxu2 %v3542_v40  ;;  %v3629_v40 = vld [vmem:[#allocation2 + $0x448] sm:$0xff] }
  0x62   : > { %2110 = vmatpush.bf16.msra.mxu0 %v3558_v41  ;;  %v315_v41 = vmul.f32 2.0, %v311_v37  ;;  %v3654_v37 = vld [vmem:[#allocation2 + $0x510] sm:$0xff] }
  0x63   : > { %2149 = vmatpush.bf16.msra.mxu3 %v3582_v46  ;;  %v3628_v46 = vld [vmem:[#allocation2 + $0x440] sm:$0xff] }
  0x64   : > { %2175 = vmatpush.bf16.msra.mxu1 %v3598_v57  ;;  %v3878_v47 = vadd.f32 -1.0, %v315_v41  ;;  %v3623_v57 = vld [vmem:[#allocation2 + $0x418] sm:$0xff] }
  0x65   : > { %2085 = vmatpush.bf16.msra.mxu2 %v3541_v44  ;;  %v3625_v44 = vld [vmem:[#allocation2 + $0x428] sm:$0xff] }
  0x66   : > { %2111 = vmatpush.bf16.msra.mxu0 %v3557_v45  ;;  %v390_v45 = vpack.c.bf16 %v340_v39, %v340_v39  ;;  %v346_v24 = vperm.slane %v3878_v47, 5  ;;  %v3679_v39 = vld [vmem:[#allocation2 + $0x5d8] sm:$0xff] }
  0x67   : > { %2150 = vmatpush.bf16.msra.mxu3 %v3581_v54  ;;  %v3649_v54 = vld [vmem:[#allocation2 + $0x4e8] sm:$0xff] }
  0x68   : > { %2176 = vmatpush.bf16.msra.mxu1 %v3597_v61  ;;  %v3647_v61 = vld [vmem:[#allocation2 + $0x4d8] sm:$0xff] }
  0x69   : > { %2086 = vmatpush.bf16.msra.mxu2 %v3540_v50  ;;  %v342_v50 = vperm.slane %v3878_v47, 1 }
  0x6a   : > { %2112 = vmatpush.bf16.msra.mxu0 %v3556_v51  ;;  %v3608_v51 = vld [vmem:[#allocation2 + $0x3a0] sm:$0xff] }
  0x6b   : > { %2151 = vmatpush.bf16.msra.mxu3 %v3580_v59  ;;  %v3606_v59 = vld [vmem:[#allocation2 + $0x390] sm:$0xff] }
  0x6c   : > { %2087 = vmatmul.bf16.vlgmr.msra.gmra.mxu2 %v381_v55  ;;  %2177 = vmatpush.bf16.msra.mxu1 %v3596_v2  ;;  %v3666_v55 = vld [vmem:[#allocation2 + $0x570] sm:$0xff]  ;;  %v339_v2 = vperm.slane %v3867_v27, 6 }
  0x6d   : > { %2131 = vmatpush.bf16.msrb.mxu2 %v3579_v52  ;;  %2113 = vmatmul.bf16.vlgmr.msra.gmra.mxu0 %v383_v56  ;;  %v3624_v52 = vld [vmem:[#allocation2 + $0x420] sm:$0xff]  ;;  %v3607_v56 = vld [vmem:[#allocation2 + $0x398] sm:$0xff]  ;;  %v3642_v27 = vld [vmem:[#allocation2 + $0x4b0] sm:$0xff] }
  0x6e   : > { %2157 = vmatpush.bf16.msrb.mxu0 %v3595_v53  ;;  %2152 = vmatmul.bf16.vlgmr.msra.gmra.mxu3 %v386_v1  ;;  %v392_v53 = vpack.c.bf16 %v342_v50, %v342_v50  ;;  %v3646_v1 = vld [vmem:[#allocation2 + $0x4d0] sm:$0xff]  ;;  %v3652_v50 = vld [vmem:[#allocation2 + $0x500] sm:$0xff] }
  0x6f   : > { %2196 = vmatpush.bf16.msrb.mxu3 %v3619_v62  ;;  %2178 = vmatmul.bf16.vlgmr.msra.gmra.mxu1 %v388_v8  ;;  %v3664_v62 = vld [vmem:[#allocation2 + $0x560] sm:$0xff]  ;;  %v3659_v8 = vld [vmem:[#allocation2 + $0x538] sm:$0xff] }
  0x70   : > { %2222 = vmatpush.bf16.msrb.mxu1 %v3635_v4  ;;  %v3663_v4 = vld [vmem:[#allocation2 + $0x558] sm:$0xff] }
  0x71   : > { %2132 = vmatpush.bf16.msrb.mxu2 %v3578_v22  ;;  %v3648_v22 = vld [vmem:[#allocation2 + $0x4e0] sm:$0xff] }
  0x72   : > { %2158 = vmatpush.bf16.msrb.mxu0 %v3594_v58  ;;  %v3665_v58 = vld [vmem:[#allocation2 + $0x568] sm:$0xff] }
  0x73   : > { %2197 = vmatpush.bf16.msrb.mxu3 %v3618_v3  ;;  %v341_v3 = vperm.slane %v3878_v47, 0 }
  0x74   : > { %2223 = vmatpush.bf16.msrb.mxu1 %v3634_v10  ;;  %v389_v10 = vpack.c.bf16 %v339_v2, %v339_v2  ;;  %v3672_v2 = vld [vmem:[#allocation2 + $0x5a0] sm:$0xff] }
  0x75   : > { %2133 = vmatpush.bf16.msrb.mxu2 %v3577_v63  ;;  %v3605_v63 = vld [vmem:[#allocation2 + $0x388] sm:$0xff] }
  0x76   : > { %2159 = vmatpush.bf16.msrb.mxu0 %v3593_v0  ;;  %v3621_v0 = vld [vmem:[#allocation2 + $0x408] sm:$0xff] }
  0x77   : > { %2198 = vmatpush.bf16.msrb.mxu3 %v3617_v9  ;;  %v3645_v9 = vld [vmem:[#allocation2 + $0x4c8] sm:$0xff] }
  0x78   : > { %2224 = vmatpush.bf16.msrb.mxu1 %v3633_v14  ;;  %v3644_v14 = vld [vmem:[#allocation2 + $0x4c0] sm:$0xff] }
  0x79   : > { %2134 = vmatpush.bf16.msrb.mxu2 %v3576_v6  ;;  %v3620_v6 = vld [vmem:[#allocation2 + $0x400] sm:$0xff] }
  0x7a   : > { %2160 = vmatpush.bf16.msrb.mxu0 %v3592_v7  ;;  %v3643_v7 = vld [vmem:[#allocation2 + $0x4b8] sm:$0xff] }
  0x7b   : > { %2199 = vmatpush.bf16.msrb.mxu3 %v3616_v13  ;;  %v3658_v13 = vld [vmem:[#allocation2 + $0x530] sm:$0xff] }
  0x7c   : > { %2225 = vmatpush.bf16.msrb.mxu1 %v3632_v18  ;;  %v3641_v18 = vld [vmem:[#allocation2 + $0x4a8] sm:$0xff] }
  0x7d   : > { %2135 = vmatpush.bf16.msrb.mxu2 %v3575_v11  ;;  %v391_v11 = vpack.c.bf16 %v341_v3, %v341_v3  ;;  %v3688_v3 = vld [vmem:[#allocation2 + $0x620] sm:$0xff] }
  0x7e   : > { %2161 = vmatpush.bf16.msrb.mxu0 %v3591_v12  ;;  %v3662_v12 = vld [vmem:[#allocation2 + $0x550] sm:$0xff] }
  0x7f   : > { %2200 = vmatpush.bf16.msrb.mxu3 %v3615_v17  ;;  %v3661_v17 = vld [vmem:[#allocation2 + $0x548] sm:$0xff] }
  0x80   : > { %2226 = vmatpush.bf16.msrb.mxu1 %v3631_v25  ;;  %v3640_v25 = vld [vmem:[#allocation2 + $0x4a0] sm:$0xff] }
  0x81   : > { %2136 = vmatpush.bf16.msrb.mxu2 %v3574_v15  ;;  %v344_v15 = vperm.slane %v3878_v47, 3 }
  0x82   : > { %2162 = vmatpush.bf16.msrb.mxu0 %v3590_v16  ;;  %v3683_v16 = vld [vmem:[#allocation2 + $0x5f8] sm:$0xff] }
  0x83   : > { %2201 = vmatpush.bf16.msrb.mxu3 %v3614_v21  ;;  %v3660_v21 = vld [vmem:[#allocation2 + $0x540] sm:$0xff] }
  0x84   : > { %2227 = vmatpush.bf16.msrb.mxu1 %v3630_v34 }
  0x85   : > { %2137 = vmatpush.bf16.msrb.mxu2 %v3573_v19  ;;  %v3657_v19 = vld [vmem:[#allocation2 + $0x528] sm:$0xff] }
  0x86   : > { %2163 = vmatpush.bf16.msrb.mxu0 %v3589_v20  ;;  %v394_v20 = vpack.c.bf16 %v344_v15, %v344_v15  ;;  %v3669_v15 = vld [vmem:[#allocation2 + $0x588] sm:$0xff] }
  0x87   : > { %2202 = vmatpush.bf16.msrb.mxu3 %v3613_v31 }
  0x88   : > { %2228 = vmatpush.bf16.msrb.mxu1 %v3629_v40 }
  0x89   : > { %2138 = vmatpush.bf16.msrb.mxu2 %v3572_v26  ;;  %v3656_v26 = vld [vmem:[#allocation2 + $0x520] sm:$0xff] }
  0x8a   : > { %2164 = vmatpush.bf16.msrb.mxu0 %v3588_v28  ;;  %v396_v28 = vpack.c.bf16 %v346_v24, %v346_v24  ;;  %v3684_v24 = vld [vmem:[#allocation2 + $0x600] sm:$0xff] }
  0x8b   : > { %2203 = vmatpush.bf16.msrb.mxu3 %v3612_v38 }
  0x8c   : > { %2139 = vmatmul.bf16.vlgmr.msrb.gmra.mxu2 %v385_v32  ;;  %2229 = vmatpush.bf16.msrb.mxu1 %v3628_v46  ;;  %v3639_v32 = vld [vmem:[#allocation2 + $0x498] sm:$0xff]  ;;  %v343_v46 = vperm.slane %v3878_v47, 2 }
  0x8d   : > { %2183 = vmatpush.bf16.msra.mxu2 %v3611_v29  ;;  %2165 = vmatmul.bf16.vlgmr.msrb.gmra.mxu0 %v387_v33  ;;  %v3681_v29 = vld [vmem:[#allocation2 + $0x5e8] sm:$0xff]  ;;  %v3655_v33 = vld [vmem:[#allocation2 + $0x518] sm:$0xff] }
  0x8e   : > { %2209 = vmatpush.bf16.msra.mxu0 %v3627_v30  ;;  %2204 = vmatmul.bf16.vlgmr.msrb.gmra.mxu3 %v390_v45  ;;  %v800_v30 = vld [vmem:[%s3998_s2] sm:$0x1] }
  0x8f   : > { %2248 = vmatpush.bf16.msra.mxu3 %v3651_v42  ;;  %2230 = vmatmul.bf16.vlgmr.msrb.gmra.mxu1 %v392_v53  ;;  %v3637_v42 = vld [vmem:[#allocation2 + $0x488] sm:$0xff]  ;;  %v3691_v53 = vld [vmem:[#allocation2 + $0x638] sm:$0xff] }
  0x90   : > { %2274 = vmatpush.bf16.msra.mxu1 %v3667_v49  ;;  %v3636_v49 = vld [vmem:[#allocation2 + $0x480] sm:$0xff] }
  0x91   : > { %2184 = vmatpush.bf16.msra.mxu2 %v3610_v35  ;;  %v3680_v35 = vld [vmem:[#allocation2 + $0x5e0] sm:$0xff] }
  0x92   : > { %2210 = vmatpush.bf16.msra.mxu0 %v3626_v36  ;;  %v3638_v36 = vld [vmem:[#allocation2 + $0x490] sm:$0xff] }
  0x93   : > { %2249 = vmatpush.bf16.msra.mxu3 %v3650_v48  ;;  %v345_v48 = vperm.slane %v3878_v47, 4 }
  0x94   : > { %2275 = vmatpush.bf16.msra.mxu1 %v3666_v55  ;;  %v3677_v55 = vld [vmem:[#allocation2 + $0x5c8] sm:$0xff] }
  0x95   : > { %2185 = vmatpush.bf16.msra.mxu2 %v3609_v43  ;;  %v3653_v43 = vld [vmem:[#allocation2 + $0x508] sm:$0xff] }
  0x96   : > { %2211 = vmatpush.bf16.msra.mxu0 %v3625_v44  ;;  %v3678_v44 = vld [vmem:[#allocation2 + $0x5d0] sm:$0xff] }
  0x97   : > { %2250 = vmatpush.bf16.msra.mxu3 %v3649_v54 }
  0x98   : > { %2276 = vmatpush.bf16.msra.mxu1 %v3665_v58  ;;  %v3690_v58 = vld [vmem:[#allocation2 + $0x630] sm:$0xff] }
  0x99   : > { %2186 = vmatpush.bf16.msra.mxu2 %v3608_v51 }
  0x9a   : > { %2212 = vmatpush.bf16.msra.mxu0 %v3624_v52  ;;  %v3675_v52 = vld [vmem:[#allocation2 + $0x5b8] sm:$0xff] }
  0x9b   : > { %2251 = vmatpush.bf16.msra.mxu3 %v3648_v22  ;;  %v3674_v22 = vld [vmem:[#allocation2 + $0x5b0] sm:$0xff] }
  0x9c   : > { %2277 = vmatpush.bf16.msra.mxu1 %v3664_v62 }
  0x9d   : > { %2187 = vmatpush.bf16.msra.mxu2 %v3607_v56  ;;  %v393_v56 = vpack.c.bf16 %v343_v46, %v343_v46 }
  0x9e   : > { %2213 = vmatpush.bf16.msra.mxu0 %v3623_v57  ;;  %v395_v57 = vpack.c.bf16 %v345_v48, %v345_v48 }
  0x9f   : > { %2252 = vmatpush.bf16.msra.mxu3 %v3647_v61 }
  0xa0   : > { %2278 = vmatpush.bf16.msra.mxu1 %v3663_v4 }
  0xa1   : > { %2188 = vmatpush.bf16.msra.mxu2 %v3606_v59  ;;  %v3676_v59 = vld [vmem:[#allocation2 + $0x5c0] sm:$0xff] }
  0xa2   : > { %2214 = vmatpush.bf16.msra.mxu0 %v3622_v60  ;;  %v348_v60 = vperm.slane %v3878_v47, 7 }
  0xa3   : > { %2253 = vmatpush.bf16.msra.mxu3 %v3646_v1 }
  0xa4   : > { %2279 = vmatpush.bf16.msra.mxu1 %v3662_v12  ;;  %v398_v1 = vpack.c.bf16 %v348_v60, %v348_v60 }
  0xa5   : > { %2189 = vmatpush.bf16.msra.mxu2 %v3605_v63  ;;  %v3673_v63 = vld [vmem:[#allocation2 + $0x5a8] sm:$0xff] }
  0xa6   : > { %2215 = vmatpush.bf16.msra.mxu0 %v3621_v0  ;;  %v3689_v0 = vld [vmem:[#allocation2 + $0x628] sm:$0xff] }
  0xa7   : > { %2254 = vmatpush.bf16.msra.mxu3 %v3645_v9  ;;  %v3670_v9 = vld [vmem:[#allocation2 + $0x590] sm:$0xff] }
  0xa8   : > { %2280 = vmatpush.bf16.msra.mxu1 %v3661_v17 }
  0xa9   : > { %2190 = vmatpush.bf16.msra.mxu2 %v3604_v5  ;;  %v3671_v5 = vld [vmem:[#allocation2 + $0x598] sm:$0xff] }
  0xaa   : > { %2216 = vmatpush.bf16.msra.mxu0 %v3620_v6  ;;  %v2010_v31 = vpop.f32.mrf.mxu0  ;;  %v3687_v6 = vld [vmem:[#allocation2 + $0x618] sm:$0xff] }
  0xab   : > { %2255 = vmatpush.bf16.msra.mxu3 %v3644_v14  ;;  %v2011_v34 = vadd.f32 %v2010_v31, %v800_v30 }
  0xac   : > { %2191 = vmatmul.bf16.vlgmr.msra.gmra.mxu2 %v389_v10  ;;  %2281 = vmatpush.bf16.msra.mxu1 %v3660_v21  ;;  %v3888_v45 = vpop.f32.mrf.mxu1  ;;  %v3686_v10 = vld [vmem:[#allocation2 + $0x610] sm:$0xff] }
  0xad   : > { %2235 = vmatpush.bf16.msrb.mxu2 %v3643_v7  ;;  %2217 = vmatmul.bf16.vlgmr.msra.gmra.mxu0 %v391_v11  ;;  %v312_v7 = vld [vmem:[%s3854_s13 + $0x18] sm:$0x1] }
  0xae   : > { %2261 = vmatpush.bf16.msrb.mxu0 %v3659_v8  ;;  %2256 = vmatmul.bf16.vlgmr.msra.gmra.mxu3 %v394_v20  ;;  %v316_v8 = vmul.f32 2.0, %v312_v7  ;;  %v3696_v7 = vld [vmem:[%s4000_s4 + $0x20] sm:$0xff] }
  0xaf   : > { %2300 = vmatpush.bf16.msrb.mxu3 %v3683_v16  ;;  %2282 = vmatmul.bf16.vlgmr.msra.gmra.mxu1 %v396_v28  ;;  %v2023_v38 = vpop.f32.mrf.mxu2  ;;  %v3685_v16 = vld [vmem:[#allocation2 + $0x608] sm:$0xff] }
  0xb0   : > { %v2024_v40 = vadd.f32 %v2023_v38, %v2011_v34 }
  0xb1   : > { %2236 = vmatpush.bf16.msrb.mxu2 %v3642_v27  ;;  %v2049_v51 = vpop.f32.mrf.mxu3  ;;  %v2652_v27 = vadd.f32 -1.0, %v316_v8 }
  0xb2   : > { %2262 = vmatpush.bf16.msrb.mxu0 %v3658_v13  ;;  %v2012_v41 = vpop.f32.mrf.mxu0 }
  0xb3   : > { %2301 = vmatpush.bf16.msrb.mxu3 %v3682_v23  ;;  %v349_v20 = vperm.slane %v2652_v27, 0  ;;  %v3668_v23 = vld [vmem:[#allocation2 + $0x580] sm:$0xff] }
  0xb4   : > { %v2077_v61 = vpop.f32.mrf.mxu1 }
  0xb5   : > { %2237 = vmatpush.bf16.msrb.mxu2 %v3641_v18 }
  0xb6   : > { %2263 = vmatpush.bf16.msrb.mxu0 %v3657_v19  ;;  %v347_v19 = vperm.slane %v3878_v47, 6 }
  0xb7   : > { %2302 = vmatpush.bf16.msrb.mxu3 %v3681_v29  ;;  %v2025_v54 = vpop.f32.mrf.mxu2  ;;  %v399_v29 = vpack.c.bf16 %v349_v20, %v349_v20 }
  0xb8   : > { %v397_v28 = vpack.c.bf16 %v347_v19, %v347_v19 }
  0xb9   : > { %2238 = vmatpush.bf16.msrb.mxu2 %v3640_v25  ;;  %v2051_v62 = vpop.f32.mrf.mxu3 }
  0xba   : > { %2264 = vmatpush.bf16.msrb.mxu0 %v3656_v26  ;;  %v3699_v62 = vld [vmem:[%s4000_s4 + $0x38] sm:$0xff] }
  0xbb   : > { %2303 = vmatpush.bf16.msrb.mxu3 %v3680_v35  ;;  %2406 = vmatpush.bf16.msrb.mxu1 %v3699_v62 }
  0xbd   : > { %2239 = vmatpush.bf16.msrb.mxu2 %v3639_v32 }
  0xbe   : > { %2265 = vmatpush.bf16.msrb.mxu0 %v3655_v33 }
  0xbf   : > { %2304 = vmatpush.bf16.msrb.mxu3 %v3679_v39 }
  0xc1   : > { %2240 = vmatpush.bf16.msrb.mxu2 %v3638_v36 }
  0xc2   : > { %2266 = vmatpush.bf16.msrb.mxu0 %v3654_v37 }
  0xc3   : > { %2305 = vmatpush.bf16.msrb.mxu3 %v3678_v44 }
  0xc5   : > { %2241 = vmatpush.bf16.msrb.mxu2 %v3637_v42 }
  0xc6   : > { %2267 = vmatpush.bf16.msrb.mxu0 %v3653_v43 }
  0xc7   : > { %2306 = vmatpush.bf16.msrb.mxu3 %v3677_v55 }
  0xc9   : > { %2242 = vmatpush.bf16.msrb.mxu2 %v3636_v49 }
  0xca   : > { %2268 = vmatpush.bf16.msrb.mxu0 %v3652_v50  ;;  %v2062_v4 = vpop.f32.mrf.mxu0 }
  0xcb   : > { %2307 = vmatpush.bf16.msrb.mxu3 %v3676_v59 }
  0xcc   : > { %2243 = vmatmul.bf16.vlgmr.msrb.gmra.mxu2 %v393_v56  ;;  %v2127_v18 = vpop.f32.mrf.mxu1 }
  0xcd   : > { %2287 = vmatpush.bf16.msra.mxu2 %v3675_v52  ;;  %2269 = vmatmul.bf16.vlgmr.msrb.gmra.mxu0 %v395_v57 }
  0xce   : > { %2313 = vmatpush.bf16.msra.mxu0 %v3691_v53  ;;  %2308 = vmatmul.bf16.vlgmr.msrb.gmra.mxu3 %v398_v1  ;;  %v3698_v1 = vld [vmem:[%s4000_s4 + $0x30] sm:$0xff] }
  0xcf   : > { %v2036_v11 = vpop.f32.mrf.mxu2  ;;  %2407 = vmatpush.bf16.msrb.mxu1 %v3698_v1 }
  0xd0   : > { %v2037_v12 = vadd.f32 %v2036_v11, %v2024_v40  ;;  %v3694_v11 = vld [vmem:[%s4000_s4 + $0x10] sm:$0xff] }
  0xd1   : > { %2288 = vmatpush.bf16.msra.mxu2 %v3674_v22  ;;  %v2101_v25 = vpop.f32.mrf.mxu3 }
  0xd2   : > { %2314 = vmatpush.bf16.msra.mxu0 %v3690_v58  ;;  %v2064_v13 = vpop.f32.mrf.mxu0  ;;  %v2050_v14 = vadd.f32 %v2049_v51, %v2037_v12 }
  0xd3   : > { %v3693_v13 = vld [vmem:[%s4000_s4 + $0x8] sm:$0xff] }
  0xd4   : > { %v2063_v17 = vadd.f32 %v2062_v4, %v2050_v14  ;;  %v2129_v30 = vpop.f32.mrf.mxu1  ;;  %v3692_v14 = vld [vmem:[%s4000_s4] sm:$0xff] }
  0xd5   : > { %2289 = vmatpush.bf16.msra.mxu2 %v3673_v63 }
  0xd6   : > { %2315 = vmatpush.bf16.msra.mxu0 %v3689_v0  ;;  %v2076_v21 = vadd.f32 %v3888_v45, %v2063_v17 }
  0xd7   : > { %v2038_v26 = vpop.f32.mrf.mxu2 }
  0xd8   : > { %v3927_v26 = vld [vmem:[%s3924_s14] sm:$0xff] }
  0xd9   : > { %2290 = vmatpush.bf16.msra.mxu2 %v3672_v2  ;;  %v2103_v31 = vpop.f32.mrf.mxu3  ;;  %vm2508_vm6 = vcmp.ne.s32.totalorder %v3927_v26, 0 }
  0xda   : > { %2316 = vmatpush.bf16.msra.mxu0 %v3688_v3  ;;  %v3931_v31 = vld [vmem:[%s3924_s14 + $0x8] sm:$0xff] }
  0xdb   : > { %vm2509_vm7 = vcmp.ne.s32.totalorder %v3931_v31, 0 }
  0xdd   : > { %2291 = vmatpush.bf16.msra.mxu2 %v3671_v5  ;;  %v3697_v5 = vld [vmem:[%s4000_s4 + $0x28] sm:$0xff] }
  0xde   : > { %2317 = vmatpush.bf16.msra.mxu0 %v3687_v6  ;;  %2408 = vmatpush.bf16.msrb.mxu1 %v3697_v5 }
  0xe1   : > { %2292 = vmatpush.bf16.msra.mxu2 %v3670_v9  ;;  %v3695_v9 = vld [vmem:[%s4000_s4 + $0x18] sm:$0xff] }
  0xe2   : > { %2318 = vmatpush.bf16.msra.mxu0 %v3686_v10  ;;  %2409 = vmatpush.bf16.msrb.mxu1 %v3696_v7 }
  0xe5   : > { %2293 = vmatpush.bf16.msra.mxu2 %v3669_v15 }
  0xe6   : > { %2319 = vmatpush.bf16.msra.mxu0 %v3685_v16  ;;  %2410 = vmatpush.bf16.msrb.mxu1 %v3695_v9 }
  0xe9   : > { %2294 = vmatpush.bf16.msra.mxu2 %v3668_v23 }
  0xea   : > { %2320 = vmatpush.bf16.msra.mxu0 %v3684_v24  ;;  %v2114_v32 = vpop.f32.mrf.mxu0  ;;  %2411 = vmatpush.bf16.msrb.mxu1 %v3694_v11 }
  0xec   : > { %2295 = vmatmul.bf16.vlgmr.msra.gmra.mxu2 %v397_v28  ;;  %v2179_v37 = vpop.f32.mrf.mxu1 }
  0xed   : > { %2321 = vmatmul.bf16.vlgmr.msra.gmra.mxu0 %v399_v29  ;;  %v3795_v29 = vmov 0  }
  0xee   : > { %2412 = vmatpush.bf16.msrb.mxu1 %v3693_v13  ;;  %3728 = vset.pattern.permute.xlu2 %v3795_v29 }
  0xef   : > { %v2088_v33 = vpop.f32.mrf.mxu2  ;;  %3729 = vset.pattern.permute.xlu0 %v3795_v29  ;;  %2480 = vperm.xlu2 %3728, %v3927_v26  }
  0xf0   : > { %v2089_v47 = vadd.f32 %v2088_v33, %v2076_v21  ;;  %3730 = vset.pattern.permute.xlu1 %v3795_v29  ;;  %v2327_v33 = vld [vmem:[%s3999_s3] sm:$0xff] }
  0xf1   : > { %v2153_v39 = vpop.f32.mrf.mxu3 }
  0xf2   : > { %v2116_v34 = vpop.f32.mrf.mxu0  ;;  %v2102_v35 = vadd.f32 %v2101_v25, %v2089_v47  ;;  %2413 = vmatpush.bf16.msrb.mxu1 %v3692_v14  ;;  %v2328_v47 = vld [vmem:[%s3999_s3 + $0x8] sm:$0xff] }
  0xf4   : > { %v2115_v36 = vadd.f32 %v2114_v32, %v2102_v35  ;;  %v2181_v41 = vpop.f32.mrf.mxu1 }
  0xf6   : > { %v2128_v38 = vadd.f32 %v2127_v18, %v2115_v36 }
  0xf7   : > { %v2090_v40 = vpop.f32.mrf.mxu2  ;;  %2483 = vperm.xlu2 %3728, %v3931_v31  }
  0xf9   : > { %v2155_v42 = vpop.f32.mrf.mxu3 }
 0x10a   : > { %v2166_v43 = vpop.f32.mrf.mxu0 }
 0x10c   : > { %v2231_v50 = vpop.f32.mrf.mxu1 }
 0x10f   : > { %v2140_v44 = vpop.f32.mrf.mxu2 }
 0x110   : > { %v2141_v45 = vadd.f32 %v2140_v44, %v2128_v38  ;;  %v2329_v38 = vld [vmem:[%s3999_s3 + $0x10] sm:$0xff] }
 0x111   : > { %v2205_v52 = vpop.f32.mrf.mxu3 }
 0x112   : > { %v2168_v46 = vpop.f32.mrf.mxu0  ;;  %v2154_v48 = vadd.f32 %v2153_v39, %v2141_v45  ;;  %v2330_v39 = vld [vmem:[%s3999_s3 + $0x18] sm:$0x3]  ;;  %v3731_v45 = vld [vmem:[%s4001_s5] ss:$0 sm:$0xff] }
 0x114   : > { %v2167_v49 = vadd.f32 %v2166_v43, %v2154_v48  ;;  %v2233_v54 = vpop.f32.mrf.mxu1  ;;  %v2425_v43 = vlaneseq }
 0x116   : > { %v2180_v51 = vadd.f32 %v2179_v37, %v2167_v49  ;;  %v3946_v44 = vand.u32 127, %v2425_v43 }
 0x117   : > { %v2142_v53 = vpop.f32.mrf.mxu2 }
 0x118   : > { %vm2427_vm0 = vcmp.lt.s32.totalorder %v3946_v44, 40  ;;  %vm2563_vm12 = vcmp.eq.s32.totalorder %v3946_v44, 1  ;;  %vm2562_vm13 = vcmp.eq.s32.totalorder %v3946_v44, 0 }
 0x119   : > { %v2207_v55 = vpop.f32.mrf.mxu3 }
 0x12a   : > { %v2218_v56 = vpop.f32.mrf.mxu0 }
 0x12c   : > { %v2283_v61 = vpop.f32.mrf.mxu1 }
 0x12f   : > { %v2192_v57 = vpop.f32.mrf.mxu2 }
 0x130   : > { %v2193_v22 = vadd.f32 %v2192_v57, %v2180_v51 }
 0x131   : > { %v2257_v0 = vpop.f32.mrf.mxu3 }
 0x132   : > { %v2220_v58 = vpop.f32.mrf.mxu0  ;;  %v2206_v59 = vadd.f32 %v2205_v52, %v2193_v22 }
 0x134   : > { %v2219_v60 = vadd.f32 %v2218_v56, %v2206_v59  ;;  %v2285_v3 = vpop.f32.mrf.mxu1  ;;  %v2477_v59 = vld [vmem:[%s3924_s14 + $0x10] sm:$0xff] }
 0x135   : > { %vm2510_vm9 = vcmp.ne.s32.totalorder %v2477_v59, 0 }
 0x136   : > { %v2232_v63 = vadd.f32 %v2231_v50, %v2219_v60  ;;  %v2478_v60 = vld [vmem:[%s3924_s14 + $0x18] sm:$0x3] }
 0x137   : > { %v2194_v2 = vpop.f32.mrf.mxu2  ;;  %vm2511_vm10 = vcmp.ne.s32.totalorder %v2478_v60, 0 }
 0x139   : > { %v2259_v4 = vpop.f32.mrf.mxu3 }
 0x149   : > { %v2481_v4 = vpop.permute.xlu2 %2480 }
 0x14a   : > { %v2270_v6 = vpop.f32.mrf.mxu0  ;;  %vm2491_vm2 = vcmp.eq.s32.totalorder %v3946_v44, %v2481_v4 }
 0x14f   : > { %v2244_v8 = vpop.f32.mrf.mxu2 }
 0x150   : > { %v2245_v16 = vadd.f32 %v2244_v8, %v2232_v63 }
 0x151   : > { %v2309_v12 = vpop.f32.mrf.mxu3 }
 0x152   : > { %v2272_v10 = vpop.f32.mrf.mxu0  ;;  %v2258_v17 = vadd.f32 %v2257_v0, %v2245_v16 }
 0x154   : > { %v2271_v19 = vadd.f32 %v2270_v6, %v2258_v17 }
 0x156   : > { %v2284_v20 = vadd.f32 %v2283_v61, %v2271_v19 }
 0x157   : > { %v2246_v27 = vpop.f32.mrf.mxu2 }
 0x159   : > { %v2311_v15 = vpop.f32.mrf.mxu3 }
 0x15a   : > { %v2484_v15 = vpop.permute.xlu2 %2483 }
 0x15b   : > { %vm2492_vm3 = vcmp.eq.s32.totalorder %v3946_v44, %v2484_v15 }
 0x16a   : > { %v2322_v18 = vpop.f32.mrf.mxu0 }
 0x16f   : > { %v2296_v21 = vpop.f32.mrf.mxu2 }
 0x170   : > { %v2297_v23 = vadd.f32 %v2296_v21, %v2284_v20 }
 0x172   : > { %v2324_v24 = vpop.f32.mrf.mxu0  ;;  %v2310_v25 = vadd.f32 %v2309_v12, %v2297_v23  ;;  %v3796_v23 = vmov 0.0  }
 0x173   : > { %v3485_v24 = vsel %vm2508_vm6, 1.0, %v3796_v23 }
 0x174   : > { %v2323_v28 = vadd.f32 %v2322_v18, %v2310_v25  ;;  %v3486_v25 = vsel %vm2509_vm7, 1.0, %v3796_v23 }
 0x175   : > { %v2547_v29 = vsel %vm2528_vm8, %v3486_v25, 0.0 }
 0x176   : > { %3732 = vtanh.f32 %v2323_v28  ;;  %v2546_v28 = vsel %vm2528_vm8, %v3485_v24, 0.0 }
 0x177   : > { %v2298_v30 = vpop.f32.mrf.mxu2 }
 0x17c   : > { %v3733_v32 = vpop.eup %3732 }
 0x17d   : > { %v2331_v34 = vperm.slane %v3733_v32, 0  ;;  %v3488_v32 = vsel %vm2511_vm10, 1.0, %v3796_v23 }
 0x17e   : > { %v2551_v31 = vsel %vm2534_vm11, %v3488_v32, 0.0 }
 0x17f   : > { %v2332_v35 = vadd.f32 %v2331_v34, %v2327_v33  ;;  %v2333_v36 = vadd.f32 %v2331_v34, %v2328_v47  ;;  %v2334_v40 = vadd.f32 %v2331_v34, %v2329_v38  ;;  %v2335_v41 = vadd.f32 %v2331_v34, %v2330_v39 }
 0x180   : > { %v3487_v33 = vsel %vm2510_vm9, 1.0, %v3796_v23  ;;  %v2548_v47 = vadd.f32 %v2547_v29, %v2546_v28 }
 0x181   : > { %v2336_v37 = vpack.c.bf16 %v2333_v36, %v2332_v35  ;;  %v2337_v42 = vpack.c.bf16 %v2335_v41, %v2334_v40  ;;  %v2549_v34 = vsel %vm2528_vm8, %v3487_v33, 0.0 }
 0x182   : > { %v2550_v26 = vadd.f32 %v2549_v34, %v2548_v47 }
 0x183   : > { %2414 = vmatmul.bf16.vlgmr.msrb.gmra.mxu1 %v2336_v37 }
 0x184   : > { %v2552_v35 = vadd.f32 %v2551_v31, %v2550_v26 }
 0x193   : > { %2419 = vmatmul.bf16.gmra.mxu1 %v2337_v42 }
 0x200   : > { %v2415_v46 = vpop.f32.mrf.mxu1 }
 0x201   : > { %v2416_v48 = vadd.f32 %v3731_v45, %v2415_v46 }
 0x203   : > { %v2428_v49 = vsel %vm2427_vm0, %v2416_v48, -1e+30 }
 0x204   : > { %2432 = vmax.xlane.f32.xlu0 %v2428_v49  ;;  %v2495_v9 = vsel %vm2491_vm2, %v2428_v49, 0.0 }
 0x208   : > { %v2417_v50 = vpop.f32.mrf.mxu1 }
 0x209   : > { %v2418_v51 = vadd.f32 %v3731_v45, %v2417_v50 }
 0x20b   : > { %v2429_v52 = vsel %vm2427_vm0, %v2418_v51, -1e+30 }
 0x20c   : > { %2434 = vmax.xlane.f32.xlu0 %v2429_v52  ;;  %v2496_v16 = vsel %vm2492_vm3, %v2429_v52, 0.0 }
 0x210   : > { %v2420_v53 = vpop.f32.mrf.mxu1 }
 0x211   : > { %v2421_v54 = vadd.f32 %v3731_v45, %v2420_v53 }
 0x213   : > { %v2430_v55 = vsel %vm2427_vm0, %v2421_v54, -1e+30 }
 0x214   : > { %2436 = vmax.xlane.f32.xlu1 %v2430_v55 }
 0x218   : > { %v2422_v56 = vpop.f32.mrf.mxu1 }
 0x219   : > { %v2423_v57 = vadd.f32 %v3731_v45, %v2422_v56 }
 0x21b   : > { %v2431_v22 = vsel %vm2427_vm0, %v2423_v57, -1e+30 }
 0x21c   : > { %v2439_v58 = vsel %vm2438_vm1, %v2431_v22, -inf }
 0x21d   : > { %2440 = vmax.xlane.f32.xlu1 %v2439_v58 }
 0x220   : > { %2486 = vperm.xlu0 %3729, %v2477_v59  }
 0x236   : > { %2489 = vperm.xlu1 %3730, %v2478_v60  }
 0x277   : > { %v3955_v61 = vpop.xlane.xlu0 %2432 }
 0x278   : > { %v2442_v62 = vsub.f32 %v2428_v49, %v3955_v61 }
 0x27a   : > { %v2446_v63 = vmul.f32 1.442695, %v2442_v62 }
 0x27c   : > { %3734 = vpow2.f32 %v2446_v63 }
 0x27f   : > { %v3958_v0 = vpop.xlane.xlu0 %2434 }
 0x280   : > { %v2443_v1 = vsub.f32 %v2429_v52, %v3958_v0 }
 0x282   : > { %v3735_v2 = vpop.eup %3734  ;;  %v2448_v3 = vmul.f32 1.442695, %v2443_v1 }
 0x283   : > { %2454 = vadd.xlane.f32.xlu2 %v3735_v2 }
 0x284   : > { %3736 = vpow2.f32 %v2448_v3 }
 0x287   : > { %v3962_v5 = vpop.xlane.xlu1 %2436 }
 0x288   : > { %v2444_v6 = vsub.f32 %v2430_v55, %v3962_v5 }
 0x28a   : > { %v3737_v7 = vpop.eup %3736  ;;  %v2450_v8 = vmul.f32 1.442695, %v2444_v6 }
 0x28b   : > { %2456 = vadd.xlane.f32.xlu1 %v3737_v7  ;;  %2499 = vadd.xlane.f32.xlu2 %v2495_v9 }
 0x28c   : > { %3738 = vpow2.f32 %v2450_v8 }
 0x290   : > { %v3965_v10 = vpop.xlane.xlu1 %2440 }
 0x291   : > { %v2445_v11 = vsub.f32 %v2431_v22, %v3965_v10 }
 0x292   : > { %v3739_v12 = vpop.eup %3738  ;;  %v2487_v17 = vpop.permute.xlu0 %2486 }
 0x293   : > { %v2452_v27 = vmul.f32 1.442695, %v2445_v11  ;;  %2458 = vadd.xlane.f32.xlu0 %v3739_v12  ;;  %vm2493_vm4 = vcmp.eq.s32.totalorder %v3946_v44, %v2487_v17 }
 0x294   : > { %v2497_v21 = vsel %vm2493_vm4, %v2430_v55, 0.0 }
 0x295   : > { %3740 = vpow2.f32 %v2452_v27 }
 0x29b   : > { %v3741_v13 = vpop.eup %3740 }
 0x29c   : > { %v2460_v14 = vsel %vm2438_vm1, %v3741_v13, 0.0 }
 0x29d   : > { %2461 = vadd.xlane.f32.xlu2 %v2460_v14 }
 0x2a5   : > { %2501 = vadd.xlane.f32.xlu2 %v2496_v16 }
 0x2a8   : > { %v2490_v18 = vpop.permute.xlu1 %2489 }
 0x2a9   : > { %vm2494_vm5 = vcmp.eq.s32.totalorder %v3946_v44, %v2490_v18 }
 0x2aa   : > { %v2498_v19 = vsel %vm2494_vm5, %v2431_v22, 0.0 }
 0x2ab   : > { %v2505_v20 = vsel %vm2438_vm1, %v2498_v19, 0.0 }
 0x2ac   : > { %2506 = vadd.xlane.f32.xlu1 %v2505_v20 }
 0x2ad   : > { %2503 = vadd.xlane.f32.xlu2 %v2497_v21 }
 0x2b4   : > { %2553 = vadd.xlane.f32.xlu1 %v2552_v35 }
 0x2f6   : > { %v2455_v30 = vpop.xlane.xlu2 %2454 }
 0x2f7   : > { %3742 = vlog2.f32 %v2455_v30 }
 0x2fd   : > { %v3743_v38 = vpop.eup %3742 }
 0x2fe   : > { %v2457_v36 = vpop.xlane.xlu1 %2456  ;;  %v2500_v37 = vpop.xlane.xlu2 %2499  ;;  %v2464_v39 = vmul.f32 0.6931472, %v3743_v38 }
 0x2ff   : > { %3744 = vlog2.f32 %v2457_v36 }
 0x300   : > { %v2471_v43 = vadd.f32 %v2464_v39, %v3955_v61 }
 0x302   : > { %v2520_v46 = vsub.f32 %v2471_v43, %v2500_v37 }
 0x304   : > { %v2524_v52 = vmul.f32 %v3485_v24, %v2520_v46 }
 0x305   : > { %v3745_v41 = vpop.eup %3744 }
 0x306   : > { %v2459_v40 = vpop.xlane.xlu0 %2458  ;;  %v2466_v45 = vmul.f32 0.6931472, %v3745_v41  ;;  %v2529_v57 = vsel %vm2528_vm8, %v2524_v52, 0.0 }
 0x308   : > { %v2472_v49 = vadd.f32 %v2466_v45, %v3958_v0 }
 0x310   : > { %v2462_v42 = vpop.xlane.xlu2 %2461 }
 0x311   : > { %3746 = vlog2.f32 %v2462_v42 }
 0x312   : > { %3748 = vlog2.f32 %v2459_v40 }
 0x317   : > { %v3747_v48 = vpop.eup %3746 }
 0x318   : > { %v3749_v50 = vpop.eup %3748  ;;  %v2502_v51 = vpop.xlane.xlu2 %2501  ;;  %v2470_v54 = vmul.f32 0.6931472, %v3747_v48 }
 0x319   : > { %v2521_v53 = vsub.f32 %v2472_v49, %v2502_v51  ;;  %v2468_v55 = vmul.f32 0.6931472, %v3749_v50 }
 0x31a   : > { %v2474_v58 = vadd.f32 %v2470_v54, %v3965_v10 }
 0x31b   : > { %v2525_v56 = vmul.f32 %v3486_v25, %v2521_v53  ;;  %v2473_v61 = vadd.f32 %v2468_v55, %v3962_v5 }
 0x31d   : > { %v2530_v22 = vsel %vm2528_vm8, %v2525_v56, 0.0 }
 0x31e   : > { %v2531_v59 = vadd.f32 %v2530_v22, %v2529_v57 }
 0x31f   : > { %v2507_v60 = vpop.xlane.xlu1 %2506 }
 0x320   : > { %v2523_v62 = vsub.f32 %v2474_v58, %v2507_v60  ;;  %v2504_v63 = vpop.xlane.xlu2 %2503 }
 0x321   : > { %v2522_v0 = vsub.f32 %v2473_v61, %v2504_v63 }
 0x322   : > { %v2527_v1 = vmul.f32 %v3488_v32, %v2523_v62 }
 0x323   : > { %v2526_v2 = vmul.f32 %v3487_v33, %v2522_v0 }
 0x324   : > { %v2535_v6 = vsel %vm2534_vm11, %v2527_v1, 0.0 }
 0x325   : > { %v2532_v3 = vsel %vm2528_vm8, %v2526_v2, 0.0 }
 0x326   : > { %v2533_v4 = vadd.f32 %v2532_v3, %v2531_v59 }
 0x327   : > { %v2554_v8 = vpop.xlane.xlu1 %2553 }
 0x328   : > { %v2536_v7 = vadd.f32 %v2535_v6, %v2533_v4  ;;  %v2555_v9 = vrot.slane %v2554_v8, 4 }
 0x32a   : > { %2537 = vadd.xlane.f32.xlu2 %v2536_v7  ;;  %v2556_v11 = vadd.f32 %v2555_v9, %v2554_v8 }
 0x32c   : > { %v2557_v10 = vrot.slane %v2556_v11, 2 }
 0x32e   : > { %v2558_v13 = vadd.f32 %v2557_v10, %v2556_v11 }
 0x330   : > { %v2559_v16 = vrot.slane %v2558_v13, 1 }
 0x332   : > { %v2560_v19 = vadd.f32 %v2559_v16, %v2558_v13 }
 0x39d   : > { %v2538_v12 = vpop.xlane.xlu2 %2537 }
 0x39e   : > { %v2539_v27 = vrot.slane %v2538_v12, 4 }
 0x3a0   : > { %v2540_v5 = vadd.f32 %v2539_v27, %v2538_v12 }
 0x3a2   : > { %v2541_v14 = vrot.slane %v2540_v5, 2 }
 0x3a4   : > { %v2542_v15 = vadd.f32 %v2541_v14, %v2540_v5 }
 0x3a6   : > { %v2543_v17 = vrot.slane %v2542_v15, 1 }
 0x3a8   : > { %v2544_v18 = vadd.f32 %v2543_v17, %v2542_v15 }
 0x3aa   : > { %3701 = vpush %v2544_v18 }
 0x3ab   : > { %3703 = vpush %v2560_v19 }
 0x3db   : > { %s3702_s26 = spop %3701 }
 0x3dc   : > { %v2566_v20 = vstv %s3702_s26  ;;  %s3704_s27 = spop %3703 }
 0x3dd   : > { %v2564_v21 = vstv %s3704_s27 }
 0x3de   : > { %v2565_v23 = vsel %vm2563_vm12, %v2564_v21, 0.0 }
 0x3df   : > { %v2567_v24 = vsel %vm2562_vm13, %v2566_v20, %v2565_v23 }
 0x3e0   : > { %2568 = vst [vmem:[%s308_s8] sm:$0x1] %v2567_v24 }
 0x3e1 PF: > { %s18_s24 = sadd.s32 1, %s3790_s24  }
 0x3e2   : > { %p15_p7 = scmp.ge.s32.totalorder %s18_s24, 4  }
 0x3e4   :  { %17 = sbr.rel (!%p15_p7) target bundleno = 1 (0x1), region = 86 }
 0x3e9   :  { %2586 = vsyncpa [#allocation3], 1 }
 0x3ea   :  { %2588 = vsyncpa [#allocation3 + $0x1], 1 }

</bundles_post_ra>
